<compile_context>
chip_gen: v7x
topology: tpu7x:2x2x1
jax: 0.10.0
libtpu: 0.0.40
codegen_flags: <defaults>
</compile_context>

<pallas_src>
import math

import jax
import jax.numpy as jnp
from jax.experimental import pallas as pl
from jax.experimental.pallas import tpu as pltpu


def _round_up(v, m):
    return -(-v // m) * m


def _make_pad_kernel(h, w, h_pad, w_pad):
    """Builds a kernel that reflection-pads a (TILE_BC, h, w) block."""

    def _rev_concat(strip, axis, n):
        # Reverse `strip` (length n along `axis`) via unit slices + one concat.
        # Kept slice-based for guaranteed Mosaic lowering; n < patch_size.
        pieces = []
        for i in range(n):
            idx = [slice(None)] * strip.ndim
            idx[axis] = slice(n - 1 - i, n - i)
            pieces.append(strip[tuple(idx)])
        return pieces[0] if n == 1 else jnp.concatenate(pieces, axis=axis)

    def kernel(x_ref, o_ref):
        # x_ref: (tile, h, w)   o_ref: (tile, h + h_pad, w + w_pad)

        # Interior: straight copy.
        o_ref[:, :h, :w] = x_ref[...]

        if w_pad > 0:
            # Right reflection: out col (w + j) <- in col (w - 2 - j).
            strip = x_ref[:, :, w - 1 - w_pad:w - 1]          # (tile, h, w_pad)
            o_ref[:, :h, w:] = _rev_concat(strip, 2, w_pad)

        if h_pad > 0:
            # Bottom reflection: out row (h + i) <- column-padded row (h-2-i).
            strip = x_ref[:, h - 1 - h_pad:h - 1, :]          # (tile, h_pad, w)
            bottom = _rev_concat(strip, 1, h_pad)
            o_ref[:, h:, :w] = bottom
            if w_pad > 0:
                corner = bottom[:, :, w - 1 - w_pad:w - 1]    # (tile, h_pad, w_pad)
                o_ref[:, h:, w:] = _rev_concat(corner, 2, w_pad)

    return kernel


def _pick_tile_and_grid(bc, in_slice_bytes, out_slice_bytes):
    """Choose (tile_bc, grid) from layout-padded per-slice VMEM footprints."""
    # Budget: double-buffered (input + output) blocks must stay <= ~24 MiB so
    # we fit comfortably under every generation's scoped-VMEM ceiling.
    vmem_budget = 24 << 20
    max_tile = max(1, vmem_budget // (2 * (in_slice_bytes + out_slice_bytes)))

    # Aim for ~4 MiB of (layout-padded) output per block: measured mem-bound
    # copies reach ~85% of HBM roofline at 512+-wide blocks vs ~63% at 256.
    target_tile = max(1, (4 << 20) // out_slice_bytes)

    tile = max(1, min(bc, max_tile, target_tile))
    grid = pl.cdiv(bc, tile)

    if bc >= 2 and grid == 1:
        # Always give the v7x megacore ("parallel" axis) something to split.
        tile = pl.cdiv(bc, 2)
        grid = pl.cdiv(bc, tile)

    if grid > 1 and grid % 2 == 1:
        # Best-effort: even step count for a balanced 2-TensorCore split.
        t2 = pl.cdiv(bc, grid + 1)
        g2 = pl.cdiv(bc, t2)
        if g2 % 2 == 0:
            tile, grid = t2, g2

    return tile, grid


def padding_tensor(x, patch_size):
    """Reproduces Padding_tensor.forward.

    Args:
      x: (B, C, H, W) array.
      patch_size: int.

    Returns:
      (x_padded, [h_patches, w_patches, h_padding, w_padding])
    """
    b, c, h, w = x.shape
    h_patches = int(math.ceil(h / patch_size))
    w_patches = int(math.ceil(w / patch_size))
    h_padding = abs(h - h_patches * patch_size)
    w_padding = abs(w - w_patches * patch_size)
    meta = [h_patches, w_patches, h_padding, w_padding]

    # Already aligned: no padding needed, skip the kernel (and the HBM copy).
    if h_padding == 0 and w_padding == 0:
        return x, meta

    # nn.ReflectionPad2d requires padding < corresponding input dimension.
    if (h_padding > h - 1) or (w_padding > w - 1):
        raise ValueError(
            "Reflection padding size must be less than the input dimension: "
            f"got h_pad={h_padding} (h={h}), w_pad={w_padding} (w={w}).")

    h_out = h + h_padding
    w_out = w + w_padding

    bc = b * c
    x_flat = x.reshape(bc, h, w)

    itemsize = x.dtype.itemsize
    # Actual VMEM footprint per (h, w)/(h_out, w_out) slice: last two dims are
    # laid out in (8, 128) tiles.
    in_slice = _round_up(h, 8) * _round_up(w, 128) * itemsize
    out_slice = _round_up(h_out, 8) * _round_up(w_out, 128) * itemsize

    tile_bc, grid = _pick_tile_and_grid(bc, in_slice, out_slice)

    # Double-buffered in + out blocks, plus a little compiler headroom.
    needed = 2 * tile_bc * (in_slice + out_slice)
    vmem_limit = int(min(64 << 20, max(needed + (4 << 20), 16 << 20)))

    kernel = _make_pad_kernel(h, w, h_padding, w_padding)

    out_flat = pl.pallas_call(
        kernel,
        out_shape=jax.ShapeDtypeStruct((bc, h_out, w_out), x.dtype),
        grid_spec=pltpu.PrefetchScalarGridSpec(
            num_scalar_prefetch=0,
            grid=(grid,),
            in_specs=[pl.BlockSpec((tile_bc, h, w), lambda i: (i, 0, 0))],
            out_specs=pl.BlockSpec((tile_bc, h_out, w_out),
                                   lambda i: (i, 0, 0)),
        ),
        compiler_params=pltpu.CompilerParams(
            dimension_semantics=("parallel",),
            vmem_limit_bytes=vmem_limit),
    )(x_flat)

    x_padded = out_flat.reshape(b, c, h_out, w_out)
    return x_padded, meta


if __name__ == "__main__":
    patch_size = 8
    key = jax.random.PRNGKey(0)

    # Case 1: non-trivial padding (13 -> 16, 14 -> 16).
    x = jax.random.normal(key, (2, 4, 13, 14), dtype=jnp.float32)
    y, meta = padding_tensor(x, patch_size)
    y = jax.block_until_ready(y)

    h_patches, w_patches, h_padding, w_padding = meta
    assert y.shape == (2, 4, 16, 16), y.shape
    assert (h_patches, w_patches, h_padding, w_padding) == (2, 2, 3, 2), meta

    y_ref = jnp.pad(
        x, ((0, 0), (0, 0), (0, h_padding), (0, w_padding)), mode="reflect")
    assert jnp.allclose(y, y_ref), "mismatch vs reflection-pad reference"

    # Case 2: already aligned (zero padding) -> early exit, identity result.
    x2 = jax.random.normal(key, (2, 4, 16, 16), dtype=jnp.float32)
    y2, meta2 = padding_tensor(x2, patch_size)
    y2 = jax.block_until_ready(y2)
    assert y2.shape == (2, 4, 16, 16)
    assert meta2 == [2, 2, 0, 0], meta2
    assert jnp.allclose(y2, x2), "zero-padding case should be an exact copy"

    # Case 3: awkward leading extent (B*C = 3) exercises the ragged cdiv grid.
    x3 = jax.random.normal(key, (1, 3, 11, 9), dtype=jnp.float32)
    y3, meta3 = padding_tensor(x3, patch_size)
    y3 = jax.block_until_ready(y3)
    _, _, h_pad3, w_pad3 = meta3
    y3_ref = jnp.pad(
        x3, ((0, 0), (0, 0), (0, h_pad3), (0, w_pad3)), mode="reflect")
    assert y3.shape == (1, 3, 16, 16), y3.shape
    assert jnp.allclose(y3, y3_ref), "mismatch on ragged-grid case"

    print("KERNEL_OK")
</pallas_src>

<mosaic_0001>
module attributes {stable_mosaic.version = 11 : i64} {
  func.func @kernel(%arg0: i32, %arg1: memref<4x13x14xf32, #tpu.memory_space<vmem>>, %arg2: memref<4x16x16xf32, #tpu.memory_space<vmem>>) attributes {dimension_semantics = [#tpu.dimension_semantics<parallel>], iteration_bounds = array<i64: 2>, scalar_prefetch = 0 : i64, scratch_operands = 0 : i64, tpu.core_type = #tpu.core_type<tc>, window_params = [{transform_indices = @transform_0, window_bounds = array<i64: 4, 13, 14>}, {transform_indices = @transform_1, window_bounds = array<i64: 4, 16, 16>}]} {
    %c0 = arith.constant 0 : index
    %c0_0 = arith.constant 0 : index
    %c0_1 = arith.constant 0 : index
    %0 = vector.load %arg1[%c0, %c0_0, %c0_1] : memref<4x13x14xf32, #tpu.memory_space<vmem>>, vector<4x13x14xf32>
    %c0_2 = arith.constant 0 : index
    %c0_3 = arith.constant 0 : index
    %c0_4 = arith.constant 0 : index
    %1 = vector.load %arg2[%c0_2, %c0_3, %c0_4] : memref<4x16x16xf32, #tpu.memory_space<vmem>>, vector<4x13x14xf32>
    tpu.vector_store %arg2[%c0_2, %c0_3, %c0_4], %0 {strides = array<i32>} : memref<4x16x16xf32, #tpu.memory_space<vmem>>, vector<4x13x14xf32>,
    %c0_5 = arith.constant 0 : index
    %c0_6 = arith.constant 0 : index
    %c11 = arith.constant 11 : index
    %2 = vector.load %arg1[%c0_5, %c0_6, %c11] : memref<4x13x14xf32, #tpu.memory_space<vmem>>, vector<4x13x2xf32>
    %3 = vector.extract_strided_slice %2 {offsets = [0, 0, 1], sizes = [4, 13, 1], strides = [1, 1, 1]} : vector<4x13x2xf32> to vector<4x13x1xf32>
    %4 = vector.extract_strided_slice %2 {offsets = [0, 0, 0], sizes = [4, 13, 1], strides = [1, 1, 1]} : vector<4x13x2xf32> to vector<4x13x1xf32>
    %5 = tpu.concatenate %3, %4 in 2 : vector<4x13x1xf32>, vector<4x13x1xf32> -> vector<4x13x2xf32>
    %c0_7 = arith.constant 0 : index
    %c0_8 = arith.constant 0 : index
    %c14 = arith.constant 14 : index
    %6 = vector.load %arg2[%c0_7, %c0_8, %c14] : memref<4x16x16xf32, #tpu.memory_space<vmem>>, vector<4x13x2xf32>
    tpu.vector_store %arg2[%c0_7, %c0_8, %c14], %5 {strides = array<i32>} : memref<4x16x16xf32, #tpu.memory_space<vmem>>, vector<4x13x2xf32>,
    %c0_9 = arith.constant 0 : index
    %c9 = arith.constant 9 : index
    %c0_10 = arith.constant 0 : index
    %7 = vector.load %arg1[%c0_9, %c9, %c0_10] : memref<4x13x14xf32, #tpu.memory_space<vmem>>, vector<4x3x14xf32>
    %8 = vector.extract_strided_slice %7 {offsets = [0, 2, 0], sizes = [4, 1, 14], strides = [1, 1, 1]} : vector<4x3x14xf32> to vector<4x1x14xf32>
    %9 = vector.extract_strided_slice %7 {offsets = [0, 1, 0], sizes = [4, 1, 14], strides = [1, 1, 1]} : vector<4x3x14xf32> to vector<4x1x14xf32>
    %10 = vector.extract_strided_slice %7 {offsets = [0, 0, 0], sizes = [4, 1, 14], strides = [1, 1, 1]} : vector<4x3x14xf32> to vector<4x1x14xf32>
    %11 = tpu.concatenate %8, %9, %10 in 1 : vector<4x1x14xf32>, vector<4x1x14xf32>, vector<4x1x14xf32> -> vector<4x3x14xf32>
    %c0_11 = arith.constant 0 : index
    %c13 = arith.constant 13 : index
    %c0_12 = arith.constant 0 : index
    %12 = vector.load %arg2[%c0_11, %c13, %c0_12] : memref<4x16x16xf32, #tpu.memory_space<vmem>>, vector<4x3x14xf32>
    tpu.vector_store %arg2[%c0_11, %c13, %c0_12], %11 {strides = array<i32>} : memref<4x16x16xf32, #tpu.memory_space<vmem>>, vector<4x3x14xf32>,
    %13 = vector.extract_strided_slice %11 {offsets = [0, 0, 11], sizes = [4, 3, 2], strides = [1, 1, 1]} : vector<4x3x14xf32> to vector<4x3x2xf32>
    %14 = vector.extract_strided_slice %13 {offsets = [0, 0, 1], sizes = [4, 3, 1], strides = [1, 1, 1]} : vector<4x3x2xf32> to vector<4x3x1xf32>
    %15 = vector.extract_strided_slice %13 {offsets = [0, 0, 0], sizes = [4, 3, 1], strides = [1, 1, 1]} : vector<4x3x2xf32> to vector<4x3x1xf32>
    %16 = tpu.concatenate %14, %15 in 2 : vector<4x3x1xf32>, vector<4x3x1xf32> -> vector<4x3x2xf32>
    %c0_13 = arith.constant 0 : index
    %c13_14 = arith.constant 13 : index
    %c14_15 = arith.constant 14 : index
    %17 = vector.load %arg2[%c0_13, %c13_14, %c14_15] : memref<4x16x16xf32, #tpu.memory_space<vmem>>, vector<4x3x2xf32>
    tpu.vector_store %arg2[%c0_13, %c13_14, %c14_15], %16 {strides = array<i32>} : memref<4x16x16xf32, #tpu.memory_space<vmem>>, vector<4x3x2xf32>,
    return
  }
  func.func @transform_0(%arg0: i32) -> (i32, i32, i32) {
    %c0_i32 = arith.constant 0 : i32
    %c0_i32_0 = arith.constant 0 : i32
    %c0_i32_1 = arith.constant 0 : i32
    return %arg0, %c0_i32, %c0_i32_0 : i32, i32, i32
  }
  func.func @transform_1(%arg0: i32) -> (i32, i32, i32) {
    %c0_i32 = arith.constant 0 : i32
    %c0_i32_0 = arith.constant 0 : i32
    %c0_i32_1 = arith.constant 0 : i32
    return %arg0, %c0_i32, %c0_i32_0 : i32, i32, i32
  }
}

</mosaic_0001>

<bundles_post_ra>
// kernel: tpu_custom_call.1
= control target key start
LH: loop header
LB: loop body
LE: loop exit
PB: predicated region body
PF: predicated region fallthrough
CT: control target
= control target key end

     0   :  { %6 = vsyncpa [#allocation3], 0  ;;  %s785_s0 = inlined_call_operand.vmem [shape: f32[8,13,14], index: 0, kind: input, shape index: {}]   ;;  %s786_s1 = inlined_call_operand.hbm [shape: f32[8,16,16], index: 1, kind: output, shape index: {}]  }
   0x1   :  { %8 = vsyncpa [#allocation3 + $0x1], 0  ;;  %s564_s6 = smov 0   ;;  %s566_s7 = smov 0  }
   0x2   :  { %s568_s8 = smov 0   ;;  %s570_s9 = smov 0  }
   0x3 LB: > { %s585_s10 = sadd.s32 4294967295, %s546_s9   ;;  %s423_s11 = sadd.s32 4294967294, %s546_s9   ;;  %s546_s9 = sphi %s570_s9, %s792_s9   ;;  %s542_s8 = sphi %s568_s8, %s791_s8   ;;  %s538_s7 = sphi %s566_s7, %s790_s7   ;;  %s534_s6 = sphi %s564_s6, %s789_s6  }
   0x4   : > { %s589_s12 = sadd.s32 1, %s546_s9   ;;  %s47_s13 = sadd.s32 1, %s542_s8 }
   0x5   : > { %s44_s14 = ssub.s32 %s546_s9, %s589_s12  ;;  %p57_p0 = scmp.ne.s32.totalorder %s542_s8, %s538_s7 }
   0x6   : > { %p45_p1 = scmp.eq.s32.totalorder %s44_s14, 0  ;;  %p58_p2 = scmp.eq.s32.totalorder %s585_s10, 1 }
   0x7   : > { %p63_p3 = scmp.ne.s32.totalorder %s538_s7, %s534_s6  ;;  %p64_p4 = scmp.eq.s32.totalorder %s423_s11, 1 }
   0x8   : > { %s600_s15 = scalar_select %p45_p1, %s542_s8, %s47_s13  }
   0x9   : > { %p602_p5 = por %p58_p2, %p57_p0  ;;  %p606_p6 = por %p64_p4, %p63_p3 }
   0xa   : > { %p426_p7 = scmp.ge.s32.totalorder %s546_s9, 1  ;;  %p92_p8 = scmp.lt.s32.totalorder %s546_s9, 3 }
   0xc   : > { %p93_p9 = pnand %p426_p7, %p92_p8 }
   0xd   : > { %s428_s18 = sshll.u32 (!%p93_p9), %s585_s10, 2  ;;  %s110_s23 = sand.u32 (!%p93_p9), 1, %s538_s7   ;;  %vm278_vm0 = vcmask (!%p93_p9), 1040384   ;;  %vm283_vm1 = vcmask (!%p93_p9), 1041408   ;;  %vm288_vm2 = vcmask (!%p93_p9), 108544   ;;  %vm131_vm3 = vcmask (!%p93_p9), 110592  }
   0xe   : > { %96 = sbr.rel (%p93_p9) target bundleno = 315 (0x13b), region = 24  ;;  %p114_p10 = scmp.lt.s32.totalorder (!%p93_p9), %s428_s18, 7  ;;  %vm129_vm4 = vcmask (!%p93_p9), 113664   ;;  %vm203_vm5 = vcmask (!%p93_p9), 7168   ;;  %vm246_vm6 = vcmask (!%p93_p9), 127088   ;;  %vm244_vm7 = vcmask (!%p93_p9), 130160  }
   0xf   : > { %s548_s24 = smov (!%p93_p9), 116   ;;  %s427_s25 = sshll.u32 (!%p93_p9), %s110_s23, 6  ;;  %vm341_vm8 = vcmask (!%p93_p9), 125040  }
  0x10   : > { %s647_s26 = scalar_lea.vmem (!%p93_p9), [#allocation2], %s427_s25  ;;  %s549_s27 = smov (!%p93_p9), 118  }
  0x11   : > { %s550_s28 = smov (!%p93_p9), 14   ;;  %s439_s29 = sshll.u32 (!%p93_p9), %s585_s10, 10 }
  0x12   : > { %s361_s30 = sshll.u32 (!%p93_p9), %s647_s26, 4  ;;  %s736_s4 = scalar_lea.hbm (!%p93_p9), %s786_s1, %s439_s29  ;;  %s738_s30 = int_to_ptr.vmem [resolvable:$true] %s361_s30 }
  0x13   : > { %s744_s5 = scalar_lea.sflag (!%p93_p9), [#allocation3], %s110_s23  ;;  %s484_s10 = scalar_lea.vmem (!%p93_p9), %s738_s30, 1024 }
  0x14   : > { %p485_p11 = scmp.ne.s32.totalorder (!%p93_p9), %s738_s30, %s484_s10  ;;  %s551_s11 = smov (!%p93_p9), [#allocation2]  }
  0x15   : > { %s794_s18 = smov (!%p114_p10, %s428_s18), 7  ;;  %s488_s13 = sshll.u32 %s551_s11, 4  ;;  %s489_s13 = int_to_ptr.vmem [resolvable:$false] %s488_s13 }
  0x16   : > { %s437_s19 = sshll.u32 %s794_s18, 4  ;;  %p486_p12 = pnand %p485_p11, %p602_p5 }
  0x17   : > { %s616_s22 = scalar_lea.vmem %s785_s0, %s437_s19  ;;  %s490_s14 = scalar_lea.vmem %s489_s13, 2048 }
  0x18   : > { %v620_v0 = vld [vmem:[%s616_s22 + $0x10] sm:$0xff]  ;;  %v623_v1 = vld [vmem:[%s616_s22] sm:$0xff]  ;;  %v142_v2 = vld [vmem:[%s616_s22 + $0x18] sm:$0x1f]  ;;  %p487_p13 = pneg %p486_p12  ;;  %p491_p0 = scmp.lt.s32.totalorder %s738_s30, %s489_s13 }
  0x19   : > { %159 = vrot.lane.b32.xlu1 %v620_v0, %s548_s24  ;;  %155 = vrot.lane.b32.xlu0 %v623_v1, %s548_s24  ;;  %v140_v3 = vld [vmem:[%s616_s22 + $0x8] sm:$0x1f]  ;;  %v255_v4 = vld [vmem:[%s616_s22 + $0x19] sm:$0x7]  ;;  %p492_p1 = scmp.lt.s32.totalorder %s490_s14, %s484_s10 }
  0x1a   : > { %v254_v5 = vld [vmem:[%s616_s22 + $0x9] sm:$0x7]  ;;  %v257_v6 = vld [vmem:[%s616_s22 + $0x39] sm:$0x7]  ;;  %v263_v7 = vrot.slane %v255_v4, 2  ;;  %v271_v8 = vrot.slane %v255_v4, 6 }
  0x1b   : > { %v262_v9 = vrot.slane %v254_v5, 2  ;;  %v270_v10 = vrot.slane %v254_v5, 6  ;;  %v256_v11 = vld [vmem:[%s616_s22 + $0x29] sm:$0x7]  ;;  %v265_v12 = vrot.slane %v257_v6, 2  ;;  %v273_v13 = vrot.slane %v257_v6, 6  ;;  %p493_p2 = por %p492_p1, %p491_p0 }
  0x1c   : > { %v264_v14 = vrot.slane %v256_v11, 2  ;;  %v272_v15 = vrot.slane %v256_v11, 6  ;;  %v144_v16 = vld [vmem:[%s616_s22 + $0x28] sm:$0x1f]  ;;  %v143_v17 = vld [vmem:[%s616_s22 + $0x20] sm:$0xff]  ;;  %v280_v18 = vsel %vm278_vm0, %v263_v7, %v255_v4  ;;  %v145_v27 = vld [vmem:[%s616_s22 + $0x30] sm:$0xff] }
  0x1d   : > { %161 = vrot.lane.b32.xlu1 %v142_v2, %s548_s24  ;;  %157 = vrot.lane.b32.xlu0 %v140_v3, %s548_s24  ;;  %v279_v19 = vsel %vm278_vm0, %v262_v9, %v254_v5  ;;  %v285_v20 = vsel %vm283_vm1, %v280_v18, %v271_v8  ;;  %v282_v22 = vsel %vm278_vm0, %v265_v12, %v257_v6  ;;  %v146_v26 = vld [vmem:[%s616_s22 + $0x38] sm:$0x1f]  ;;  %v122_v30 = vld [vmem:[%s616_s22 + $0x8] sm:$0x1f]  ;;  %p494_p3 = pnand %p493_p2, %p487_p13 }
  0x1e   : > { %v284_v21 = vsel %vm283_vm1, %v279_v19, %v270_v10  ;;  %v281_v23 = vsel %vm278_vm0, %v264_v14, %v256_v11  ;;  %290 = vst.msk [vmem:[%s647_s26 + $0x1d] sm:$0x7] %vm288_vm2, %v285_v20  ;;  %v287_v24 = vsel %vm283_vm1, %v282_v22, %v273_v13  ;;  %v124_v33 = vld [vmem:[%s616_s22 + $0x18] sm:$0x1f]  ;;  %v126_v36 = vld [vmem:[%s616_s22 + $0x28] sm:$0x1f] }
  0x1f   : > { %289 = vst.msk [vmem:[%s647_s26 + $0xd] sm:$0x7] %vm288_vm2, %v284_v21  ;;  %v286_v25 = vsel %vm283_vm1, %v281_v23, %v272_v15  ;;  %292 = vst.msk [vmem:[%s647_s26 + $0x3d] sm:$0x7] %vm288_vm2, %v287_v24  ;;  %v128_v39 = vld [vmem:[%s616_s22 + $0x38] sm:$0x1f] }
  0x20   : > { %291 = vst.msk [vmem:[%s647_s26 + $0x2d] sm:$0x7] %vm288_vm2, %v286_v25 }
  0x21   : > { %165 = vrot.lane.b32.xlu1 %v144_v16, %s548_s24  ;;  %163 = vrot.lane.b32.xlu0 %v143_v17, %s548_s24  ;;  %132 = vst.msk [vmem:[%s647_s26 + $0x8] sm:$0x1f] %vm131_vm3, %v122_v30  ;;  %134 = vst.msk [vmem:[%s647_s26 + $0x18] sm:$0x1f] %vm131_vm3, %v124_v33 }
  0x22   : > { %130 = vst.msk [vmem:[%s647_s26] sm:$0xff] %vm129_vm4, %v623_v1  ;;  %133 = vst.msk [vmem:[%s647_s26 + $0x10] sm:$0xff] %vm129_vm4, %v620_v0 }
  0x23   : > { %135 = vst.msk [vmem:[%s647_s26 + $0x20] sm:$0xff] %vm129_vm4, %v143_v17  ;;  %137 = vst.msk [vmem:[%s647_s26 + $0x30] sm:$0xff] %vm129_vm4, %v145_v27 }
  0x24   : > { %136 = vst.msk [vmem:[%s647_s26 + $0x28] sm:$0x1f] %vm131_vm3, %v126_v36  ;;  %138 = vst.msk [vmem:[%s647_s26 + $0x38] sm:$0x1f] %vm131_vm3, %v128_v39 }
  0x25   : > { %169 = vrot.lane.b32.xlu1 %v146_v26, %s548_s24  ;;  %167 = vrot.lane.b32.xlu0 %v145_v27, %s548_s24 }
  0x29   : > { %181 = vrot.lane.b32.xlu1 %v140_v3, %s549_s27  ;;  %179 = vrot.lane.b32.xlu0 %v623_v1, %s549_s27 }
  0x2d   : > { %185 = vrot.lane.b32.xlu1 %v142_v2, %s549_s27  ;;  %183 = vrot.lane.b32.xlu0 %v620_v0, %s549_s27 }
  0x31   : > { %189 = vrot.lane.b32.xlu1 %v144_v16, %s549_s27  ;;  %187 = vrot.lane.b32.xlu0 %v143_v17, %s549_s27 }
  0x35   : > { %193 = vrot.lane.b32.xlu1 %v146_v26, %s549_s27  ;;  %191 = vrot.lane.b32.xlu0 %v145_v27, %s549_s27 }
  0x39   : > { %299 = vrot.lane.b32.xlu1 %v285_v20, %s548_s24  ;;  %297 = vrot.lane.b32.xlu0 %v284_v21, %s548_s24 }
  0x3d   : > { %303 = vrot.lane.b32.xlu1 %v287_v24, %s548_s24  ;;  %301 = vrot.lane.b32.xlu0 %v286_v25, %s548_s24 }
  0x41   : > { %311 = vrot.lane.b32.xlu1 %v285_v20, %s549_s27  ;;  %309 = vrot.lane.b32.xlu0 %v284_v21, %s549_s27 }
  0x45   : > { %315 = vrot.lane.b32.xlu1 %v287_v24, %s549_s27  ;;  %313 = vrot.lane.b32.xlu0 %v286_v25, %s549_s27 }
  0x8b   : > { %v160_v28 = vpop.permute.xlu1 %159  ;;  %v156_v29 = vpop.permute.xlu0 %155 }
  0x8f   : > { %v162_v31 = vpop.permute.xlu1 %161  ;;  %v158_v32 = vpop.permute.xlu0 %157 }
  0x93   : > { %v166_v34 = vpop.permute.xlu1 %165  ;;  %v164_v35 = vpop.permute.xlu0 %163 }
  0x97   : > { %v170_v37 = vpop.permute.xlu1 %169  ;;  %v168_v38 = vpop.permute.xlu0 %167 }
  0x9b   : > { %v182_v40 = vpop.permute.xlu1 %181  ;;  %v180_v41 = vpop.permute.xlu0 %179 }
  0x9c   : > { %v205_v42 = vsel %vm203_vm5, %v158_v32, %v182_v40  ;;  %v204_v43 = vsel %vm203_vm5, %v156_v29, %v180_v41 }
  0x9d   : > { %222 = vrot.lane.b32.xlu1 %v205_v42, %s550_s28  ;;  %220 = vrot.lane.b32.xlu0 %v204_v43, %s550_s28 }
  0x9f   : > { %v186_v44 = vpop.permute.xlu1 %185  ;;  %v184_v45 = vpop.permute.xlu0 %183 }
  0xa0   : > { %v207_v46 = vsel %vm203_vm5, %v162_v31, %v186_v44  ;;  %v206_v47 = vsel %vm203_vm5, %v160_v28, %v184_v45 }
  0xa1   : > { %226 = vrot.lane.b32.xlu1 %v207_v46, %s550_s28  ;;  %224 = vrot.lane.b32.xlu0 %v206_v47, %s550_s28 }
  0xa3   : > { %v190_v48 = vpop.permute.xlu1 %189  ;;  %v188_v49 = vpop.permute.xlu0 %187 }
  0xa4   : > { %v209_v50 = vsel %vm203_vm5, %v166_v34, %v190_v48  ;;  %v208_v51 = vsel %vm203_vm5, %v164_v35, %v188_v49 }
  0xa5   : > { %230 = vrot.lane.b32.xlu1 %v209_v50, %s550_s28  ;;  %228 = vrot.lane.b32.xlu0 %v208_v51, %s550_s28 }
  0xa7   : > { %v194_v52 = vpop.permute.xlu1 %193  ;;  %v192_v53 = vpop.permute.xlu0 %191 }
  0xa8   : > { %v211_v54 = vsel %vm203_vm5, %v170_v37, %v194_v52  ;;  %v210_v55 = vsel %vm203_vm5, %v168_v38, %v192_v53 }
  0xa9   : > { %234 = vrot.lane.b32.xlu1 %v211_v54, %s550_s28  ;;  %232 = vrot.lane.b32.xlu0 %v210_v55, %s550_s28 }
  0xab   : > { %v300_v56 = vpop.permute.xlu1 %299  ;;  %v298_v57 = vpop.permute.xlu0 %297 }
  0xaf   : > { %v304_v58 = vpop.permute.xlu1 %303  ;;  %v302_v59 = vpop.permute.xlu0 %301 }
  0xb3   : > { %v312_v60 = vpop.permute.xlu1 %311  ;;  %v310_v61 = vpop.permute.xlu0 %309 }
  0xb4   : > { %v322_v62 = vsel %vm203_vm5, %v300_v56, %v312_v60  ;;  %v321_v63 = vsel %vm203_vm5, %v298_v57, %v310_v61 }
  0xb5   : > { %331 = vrot.lane.b32.xlu1 %v322_v62, %s550_s28  ;;  %329 = vrot.lane.b32.xlu0 %v321_v63, %s550_s28 }
  0xb7   : > { %v316_v0 = vpop.permute.xlu1 %315  ;;  %v314_v1 = vpop.permute.xlu0 %313 }
  0xb8   : > { %v324_v2 = vsel %vm203_vm5, %v304_v58, %v316_v0  ;;  %v323_v3 = vsel %vm203_vm5, %v302_v59, %v314_v1 }
  0xb9   : > { %335 = vrot.lane.b32.xlu1 %v324_v2, %s550_s28  ;;  %333 = vrot.lane.b32.xlu0 %v323_v3, %s550_s28 }
 0x10f   : > { %v223_v4 = vpop.permute.xlu1 %222  ;;  %v221_v5 = vpop.permute.xlu0 %220 }
 0x110   : > { %247 = vst.msk [vmem:[%s647_s26 + $0x8] sm:$0x1f] %vm246_vm6, %v223_v4 }
 0x111   : > { %245 = vst.msk [vmem:[%s647_s26] sm:$0xff] %vm244_vm7, %v221_v5 }
 0x113   : > { %v227_v6 = vpop.permute.xlu1 %226  ;;  %v225_v7 = vpop.permute.xlu0 %224 }
 0x114   : > { %249 = vst.msk [vmem:[%s647_s26 + $0x18] sm:$0x1f] %vm246_vm6, %v227_v6 }
 0x115   : > { %248 = vst.msk [vmem:[%s647_s26 + $0x10] sm:$0xff] %vm244_vm7, %v225_v7 }
 0x117   : > { %v231_v8 = vpop.permute.xlu1 %230  ;;  %v229_v9 = vpop.permute.xlu0 %228 }
 0x118   : > { %251 = vst.msk [vmem:[%s647_s26 + $0x28] sm:$0x1f] %vm246_vm6, %v231_v8 }
 0x119   : > { %250 = vst.msk [vmem:[%s647_s26 + $0x20] sm:$0xff] %vm244_vm7, %v229_v9 }
 0x11b   : > { %v235_v10 = vpop.permute.xlu1 %234  ;;  %v233_v11 = vpop.permute.xlu0 %232 }
 0x11c   : > { %253 = vst.msk [vmem:[%s647_s26 + $0x38] sm:$0x1f] %vm246_vm6, %v235_v10 }
 0x11d   : > { %252 = vst.msk [vmem:[%s647_s26 + $0x30] sm:$0xff] %vm244_vm7, %v233_v11 }
 0x127   : > { %v332_v12 = vpop.permute.xlu1 %331  ;;  %v330_v13 = vpop.permute.xlu0 %329 }
 0x128   : > { %343 = vst.msk [vmem:[%s647_s26 + $0x1d] sm:$0x7] %vm341_vm8, %v332_v12  ;;  %342 = vst.msk [vmem:[%s647_s26 + $0xd] sm:$0x7] %vm341_vm8, %v330_v13 }
 0x12b   : > { %v336_v14 = vpop.permute.xlu1 %335  ;;  %v334_v15 = vpop.permute.xlu0 %333 }
 0x12c   : > { %345 = vst.msk [vmem:[%s647_s26 + $0x3d] sm:$0x7] %vm341_vm8, %v336_v14  ;;  %344 = vst.msk [vmem:[%s647_s26 + $0x2d] sm:$0x7] %vm341_vm8, %v334_v15 }
 0x12d   : > { %497 = shalt.err (!%p494_p3)
}
 0x12e   : > { %s498_s18 = scalar_lea.hbm %s736_s4, 1024  ;;  %s502_s21 = scalar_lea.hbm %s786_s1, 2048 }
 0x12f   : > { %p499_p4 = scmp.ne.s32.totalorder %s736_s4, %s498_s18  ;;  %p503_p9 = scmp.lt.u32.totalorder %s736_s4, %s786_s1 }
 0x130   : > { %p504_p10 = scmp.lt.u32.totalorder %s502_s21, %s498_s18  ;;  %p506_p12 = scmp.lt.u32.totalorder %s498_s18, %s736_s4 }
 0x131   : > { %p500_p7 = pnand %p499_p4, %p602_p5 }
 0x132   : > { %p505_p11 = por %p504_p10, %p503_p9 }
 0x133   : > { %p501_p8 = pneg %p500_p7 }
 0x134   : > { %p507_p13 = por %p506_p12, %p505_p11 }
 0x136   : > { %p508_p0 = pnand %p507_p13, %p501_p8 }
 0x138   : > { %511 = shalt.err (!%p508_p0)
}
 0x139   : > { %s552_s24 = smov 128   ;;  %s553_s25 = smov 8  }
 0x13a   : > { %440 = dma.vmem_to_hbm [thread:$0]  (%p602_p5), %s738_s30, 1024, %s736_s4, %s744_s5, %s552_s24, %s552_s24, %s553_s25  }
 0x13b PF: > { %p446_p1 = scmp.ge.s32.totalorder %s546_s9, 2  ;;  %s376_s26 = sand.u32 1, %s534_s6  }
 0x13c   : > { %s377_s27 = scalar_lea.sflag [#allocation3], %s376_s26 }
 0x13d   : > { %p443_p2 = pnand %p446_p1, %p606_p6 }
 0x13f   : > { %529 = dma.done.wait (!%p443_p2), %s377_s27, 1024  }
 0x140   : > { %531 = vsyncadd (!%p443_p2), %s377_s27, 4294966272  ;;  %p11_p3 = scmp.ge.s32.totalorder %s589_s12, 4   ;;  %s789_s6 = smov %s538_s7 }
 0x141   : > { %s790_s7 = smov %s542_s8  ;;  %s791_s8 = smov %s600_s15 }
 0x142   : > { %s792_s9 = smov %s589_s12  ;;  %13 = sbr.rel (!%p11_p3) target bundleno = 3 (0x3), region = 59 }
 0x149   :  { %382 = vsyncpa [#allocation3], 1 }
 0x14a   :  { %384 = vsyncpa [#allocation3 + $0x1], 1 }

</bundles_post_ra>
